<compile_context>
chip_gen: v7x
topology: tpu7x:2x2x1
jax: 0.10.0
libtpu: 0.0.40
codegen_flags: <defaults>
</compile_context>

<pallas_src>
import jax
import jax.numpy as jnp
from jax.experimental import pallas as pl
from jax.experimental.pallas import tpu as pltpu

GRAD_CLIP = 0.01

_LANES = 128                 # last dim of every block: one full vreg lane width
_MAX_TILE_ROWS = 2048        # 2048 * 128 * 4B = 1 MiB per f32 buffer (multiple of 8)


# ----------------------------- kernel ---------------------------------------

def _clip_kernel(g_ref, o_ref):
    # backward: zero gradients whose magnitude exceeds GRAD_CLIP.
    # NaN fails the <= comparison, so the same select zeroes it.
    g = g_ref[...]
    o_ref[...] = jnp.where(jnp.abs(g) <= GRAD_CLIP, g, jnp.zeros_like(g))


# ----------------------------- wrapper ---------------------------------------

def _clip_grad(g):
    """Elementwise gradient clip via a tiled, lane-dense Pallas kernel."""
    orig_shape = g.shape
    total = g.size
    if total == 0:
        return g

    flat = g.reshape(-1)

    # Lane-dense slab: (rows, 128).  Only pad (a real copy) when the element
    # count is not a multiple of the lane width; pad zeros are clip-invariant.
    rows = pl.cdiv(total, _LANES)
    padded_total = rows * _LANES
    if padded_total != total:
        flat = jnp.pad(flat, (0, padded_total - total))
    slab = flat.reshape(rows, _LANES)

    if rows <= _MAX_TILE_ROWS:
        tile_rows = rows                    # single full-extent block
    else:
        tile_rows = _MAX_TILE_ROWS          # multiple of 8 -> aligned sublanes

    grid = (pl.cdiv(rows, tile_rows),)      # last block may be partial (masked)
    block = pl.BlockSpec((tile_rows, _LANES), lambda i: (i, 0))

    out = pl.pallas_call(
        _clip_kernel,
        out_shape=jax.ShapeDtypeStruct(slab.shape, slab.dtype),
        grid=grid,
        in_specs=[block],
        out_specs=block,
        compiler_params=pltpu.CompilerParams(
            dimension_semantics=("parallel",),      # shard rows across TCs (v7x)
            vmem_limit_bytes=32 * 1024 * 1024,      # >> 4 MiB actually used
        ),
    )(slab)

    if padded_total != total:
        out = out.reshape(-1)[:total]
    return out.reshape(orig_shape)


@jax.custom_vjp
def gradient_clip(x):
    # forward is pure identity: no kernel, no HBM traffic.
    return x


def _gradient_clip_fwd(x):
    return x, None


def _gradient_clip_bwd(_, g):
    return (_clip_grad(g),)


gradient_clip.defvjp(_gradient_clip_fwd, _gradient_clip_bwd)


# ------------------------------- main ----------------------------------------

if __name__ == "__main__":
    key = jax.random.PRNGKey(0)
    # NCHW, small shapes consistent with a feature map
    x = jax.random.normal(key, (2, 4, 16, 16), dtype=jnp.float32)

    # forward: must be exactly identity
    y = gradient_clip(x)
    y = jax.block_until_ready(y)
    assert y.shape == x.shape and y.dtype == x.dtype
    assert jnp.array_equal(y, x)

    # backward: upstream grad of sum() is all-ones -> |1| > GRAD_CLIP -> zeros
    gx = jax.grad(lambda t: jnp.sum(gradient_clip(t)))(x)
    gx = jax.block_until_ready(gx)
    assert jnp.array_equal(gx, jnp.zeros_like(x))

    # backward with small upstream grads passes them through unchanged
    small = jnp.full_like(x, 0.005)
    _, vjp_fn = jax.vjp(gradient_clip, x)
    (gx2,) = vjp_fn(small)
    gx2 = jax.block_until_ready(gx2)
    assert jnp.allclose(gx2, small)

    # backward with NaNs and mixed magnitudes
    g_mixed = small.at[0, 0, 0, 0].set(jnp.nan).at[1, 2, 3, 4].set(5.0)
    (gx3,) = vjp_fn(g_mixed)
    gx3 = jax.block_until_ready(gx3)
    expected = small.at[0, 0, 0, 0].set(0.0).at[1, 2, 3, 4].set(0.0)
    assert jnp.array_equal(gx3, expected)

    # non-lane-aligned element count exercises the pad path
    x_odd = jax.random.normal(jax.random.PRNGKey(1), (3, 5, 7), dtype=jnp.float32)
    g_odd = 0.5 * x_odd
    _, vjp_odd = jax.vjp(gradient_clip, x_odd)
    (gx4,) = vjp_odd(g_odd)
    gx4 = jax.block_until_ready(gx4)
    expected_odd = jnp.where(jnp.abs(g_odd) > GRAD_CLIP, 0.0, g_odd)
    assert jnp.array_equal(gx4, expected_odd)

    print("KERNEL_OK")
</pallas_src>

<mosaic_0001>
module attributes {stable_mosaic.version = 11 : i64} {
  func.func @_clip_kernel(%arg0: i32, %arg1: memref<16x128xf32, #tpu.memory_space<vmem>>, %arg2: memref<16x128xf32, #tpu.memory_space<vmem>>) attributes {dimension_semantics = [#tpu.dimension_semantics<parallel>], iteration_bounds = array<i64: 1>, scalar_prefetch = 0 : i64, scratch_operands = 0 : i64, tpu.core_type = #tpu.core_type<tc>, window_params = [{transform_indices = @transform_0, window_bounds = array<i64: 16, 128>}, {transform_indices = @transform_1, window_bounds = array<i64: 16, 128>}]} {
    %c0 = arith.constant 0 : index
    %c0_0 = arith.constant 0 : index
    %0 = vector.load %arg1[%c0, %c0_0] : memref<16x128xf32, #tpu.memory_space<vmem>>, vector<16x128xf32>
    %1 = math.absf %0 : vector<16x128xf32>
    %cst = arith.constant 0.00999999977 : f32
    %2 = vector.broadcast %cst : f32 to vector<16x128xf32>
    %3 = arith.cmpf ole, %1, %2 : vector<16x128xf32>
    %cst_1 = arith.constant 0.000000e+00 : f32
    %4 = vector.broadcast %cst_1 : f32 to vector<16x128xf32>
    %5 = arith.select %3, %0, %4 : vector<16x128xi1>, vector<16x128xf32>
    %c0_2 = arith.constant 0 : index
    %c0_3 = arith.constant 0 : index
    %6 = vector.load %arg2[%c0_2, %c0_3] : memref<16x128xf32, #tpu.memory_space<vmem>>, vector<16x128xf32>
    tpu.vector_store %arg2[%c0_2, %c0_3], %5 {strides = array<i32>} : memref<16x128xf32, #tpu.memory_space<vmem>>, vector<16x128xf32>,
    return
  }
  func.func @transform_0(%arg0: i32) -> (i32, i32) {
    %c0_i32 = arith.constant 0 : i32
    %c0_i32_0 = arith.constant 0 : i32
    return %arg0, %c0_i32 : i32, i32
  }
  func.func @transform_1(%arg0: i32) -> (i32, i32) {
    %c0_i32 = arith.constant 0 : i32
    %c0_i32_0 = arith.constant 0 : i32
    return %arg0, %c0_i32 : i32, i32
  }
}

</mosaic_0001>

<bundles_post_ra>
// kernel: tpu_custom_call.1
= control target key start
LH: loop header
LB: loop body
LE: loop exit
PB: predicated region body
PF: predicated region fallthrough
CT: control target
= control target key end

     0   :  { %6 = vsyncpa [#allocation3], 0  ;;  %s146_s0 = inlined_call_operand.hbm [shape: f32[16,128], index: 0, kind: input, shape index: {}]   ;;  %s147_s1 = inlined_call_operand.hbm [shape: f32[16,128], index: 1, kind: output, shape index: {}]  }
   0x1   :  { %7 = vsyncpa [#allocation4], 0  ;;  %s102_s6 = smov [#allocation2]   ;;  %s54_s10 = scalar_lea.hbm %s146_s0, 256 }
   0x2   :  { %s13_s7 = sshll.u32 %s102_s6, 4  ;;  %p55_p0 = scmp.ne.s32.totalorder %s146_s0, %s54_s10  ;;  %s14_s7 = int_to_ptr.vmem [resolvable:$true] %s13_s7 }
   0x3   :  { %p58_p1 = scmp.lt.u32.totalorder %s54_s10, %s146_s0 }
   0x5   :  { %p60_p2 = pnand %p58_p1, %p55_p0 }
   0x7   :  { %63 = shalt.err (!%p60_p2)
}
   0x8   :  { %s64_s15 = scalar_lea.vmem %s14_s7, 256  ;;  %p69_p4 = scmp.lt.s32.totalorder %s14_s7, %s14_s7 }
   0x9   :  { %p65_p3 = scmp.ne.s32.totalorder %s14_s7, %s64_s15  ;;  %p70_p5 = scmp.lt.s32.totalorder %s64_s15, %s64_s15 }
   0xb   :  { %p71_p6 = por %p70_p5, %p69_p4 }
   0xd   :  { %p72_p7 = pnand %p71_p6, %p65_p3 }
   0xf   :  { %75 = shalt.err (!%p72_p7)
}
  0x10   :  { %s103_s16 = smov 128   ;;  %s104_s17 = smov 8  }
  0x11   :  { %19 = dma.hbm_to_vmem [thread:$0]  %s146_s0, 256, %s14_s7, [#allocation3], %s103_s16, %s103_s16, %s104_s17  }
  0x12   :  { %98 = dma.done.wait [#allocation3], 256  }
  0x13   :  { %99 = vsyncadd [#allocation3], 4294967040  ;;  %v23_v0 = vld [vmem:[#allocation2] sm:$0xff]  ;;  %v24_v1 = vld [vmem:[#allocation2 + $0x8] sm:$0xff]  ;;  %s105_s20 = smov [#allocation5]  }
  0x14   :  { %s38_s21 = sshll.u32 %s105_s20, 4  ;;  %v25_v2 = vand.u32 2147483647, %v23_v0  ;;  %v26_v3 = vand.u32 2147483647, %v24_v1  ;;  %s39_s21 = int_to_ptr.vmem [resolvable:$true] %s38_s21 }
  0x15   :  { %s76_s22 = scalar_lea.vmem %s39_s21, 256  ;;  %p81_p9 = scmp.lt.s32.totalorder %s39_s21, %s39_s21 }
  0x16   :  { %vm27_vm0 = vcmp.le.f32.partialorder %v25_v2, 0.01  ;;  %vm28_vm1 = vcmp.le.f32.partialorder %v26_v3, 0.01  ;;  %p77_p8 = scmp.ne.s32.totalorder %s39_s21, %s76_s22  ;;  %p82_p10 = scmp.lt.s32.totalorder %s76_s22, %s76_s22 }
  0x17   :  { %v29_v4 = vsel %vm27_vm0, %v23_v0, 0.0  ;;  %v30_v5 = vsel %vm28_vm1, %v24_v1, 0.0 }
  0x18   :  { %31 = vst [vmem:[#allocation5] sm:$0xff] %v29_v4  ;;  %32 = vst [vmem:[#allocation5 + $0x8] sm:$0xff] %v30_v5  ;;  %p83_p11 = por %p82_p10, %p81_p9 }
  0x1a   :  { %p84_p12 = pnand %p83_p11, %p77_p8 }
  0x1c   :  { %87 = shalt.err (!%p84_p12)
}
  0x1d   :  { %s88_s24 = scalar_lea.hbm %s147_s1, 256 }
  0x1e   :  { %p89_p13 = scmp.ne.s32.totalorder %s147_s1, %s88_s24  ;;  %p92_p0 = scmp.lt.u32.totalorder %s88_s24, %s147_s1 }
  0x20   :  { %p94_p1 = pnand %p92_p0, %p89_p13 }
  0x22   :  { %97 = shalt.err (!%p94_p1)
}
  0x23   :  { %44 = dma.vmem_to_hbm [thread:$0]  %s39_s21, 256, %s147_s1, [#allocation4], %s103_s16, %s103_s16, %s104_s17  }
  0x24   :  { %100 = dma.done.wait [#allocation4], 256  }
  0x25   :  { %101 = vsyncadd [#allocation4], 4294967040 }
  0x26   :  { %48 = vsyncpa [#allocation3], 1 }
  0x27   :  { %49 = vsyncpa [#allocation4], 1 }

</bundles_post_ra>
